<compile_context>
chip_gen: v6e
topology: v6e:2x2x1
jax: 0.10.0
libtpu: 0.0.40
codegen_flags: <defaults>
</compile_context>

<pallas_src>
import jax
import jax.numpy as jnp
from jax import lax
from jax.experimental import pallas as pl
from jax.experimental.pallas import tpu as pltpu

IN_FEATURES = 79
HIDDEN = 10
OUT_LANES = 128      # lane-dense output slab width
BATCH_TILE = 8       # sublane-aligned per-grid-step batch tile


def _lstm_last_plus_linear_kernel(
    x_ref,      # (T, Bt, F)       time-major inputs for this batch tile
    w_ih_ref,   # (F, 4H)          fused input->gate weights   [i | f | g | o]
    w_hh_ref,   # (H, 4H)          fused hidden->gate weights  [i | f | g | o]
    b_ref,      # (1, 4H)          fused gate bias
    wl_ref,     # (H, 1)           final linear weight
    bl_ref,     # (1, 1)           final linear bias
    out_ref,    # (Bt, OUT_LANES)  lane-dense output slab (column 0 = result)
):
    T, Bt, F = x_ref.shape
    H = w_hh_ref.shape[0]

    w_hh = w_hh_ref[...]

    # Hoisted input projection: one MXU matmul covering every timestep.
    x_flat = x_ref[...].reshape(T * Bt, F)
    gx = (jnp.dot(x_flat, w_ih_ref[...], preferred_element_type=jnp.float32)
          + b_ref[...])                                        # (T*Bt, 4H)

    h = jnp.zeros((Bt, H), jnp.float32)
    c = jnp.zeros((Bt, H), jnp.float32)

    # T is small and static -> fully unrolled recurrence; one MXU push / step.
    for t in range(T):
        gates = gx[t * Bt:(t + 1) * Bt, :] + jnp.dot(
            h, w_hh, preferred_element_type=jnp.float32)       # (Bt, 4H)
        i_t = jax.nn.sigmoid(gates[:, 0 * H:1 * H])
        f_t = jax.nn.sigmoid(gates[:, 1 * H:2 * H])
        g_t = jnp.tanh(gates[:, 2 * H:3 * H])
        o_t = jax.nn.sigmoid(gates[:, 3 * H:4 * H])
        c = f_t * c + i_t * g_t
        h = o_t * jnp.tanh(c)

    y = jnp.dot(h, wl_ref[...], preferred_element_type=jnp.float32) + bl_ref[...]
    out_ref[...] = jnp.broadcast_to(y, out_ref.shape)          # lane-dense store


def cost_estimation_net_forward(x, params):
    """x: (B, T, 79) float32, batch-first like the PyTorch module. Returns (B, 1)."""
    w_ih, w_hh, bias, w_lin, b_lin = params
    B, T, F = x.shape
    H = HIDDEN

    # Pad batch to a sublane-aligned tile and go time-major.
    Bp = ((B + BATCH_TILE - 1) // BATCH_TILE) * BATCH_TILE
    x_tm = jnp.transpose(x, (1, 0, 2)).astype(jnp.float32)     # (T, B, F)
    x_tm = jnp.pad(x_tm, ((0, 0), (0, Bp - B), (0, 0)))

    w_ih_f = w_ih.astype(jnp.float32)                          # (F, 4H), order i,f,g,o
    w_hh_f = w_hh.astype(jnp.float32)                          # (H, 4H)
    b_row = bias.reshape(1, 4 * H).astype(jnp.float32)         # (1, 4H)
    wl = w_lin.T.astype(jnp.float32)                           # (H, 1)
    bl = b_lin.reshape(1, 1).astype(jnp.float32)               # (1, 1)

    grid = (Bp // BATCH_TILE,)

    out_padded = pl.pallas_call(
        _lstm_last_plus_linear_kernel,
        out_shape=jax.ShapeDtypeStruct((Bp, OUT_LANES), jnp.float32),
        grid=grid,
        in_specs=[
            pl.BlockSpec((T, BATCH_TILE, F), lambda b: (0, b, 0)),
            pl.BlockSpec((F, 4 * H), lambda b: (0, 0)),
            pl.BlockSpec((H, 4 * H), lambda b: (0, 0)),
            pl.BlockSpec((1, 4 * H), lambda b: (0, 0)),
            pl.BlockSpec((H, 1), lambda b: (0, 0)),
            pl.BlockSpec((1, 1), lambda b: (0, 0)),
        ],
        out_specs=pl.BlockSpec((BATCH_TILE, OUT_LANES), lambda b: (b, 0)),
        compiler_params=pltpu.CompilerParams(
            dimension_semantics=("parallel",)),
    )(x_tm, w_ih_f, w_hh_f, b_row, wl, bl)

    return out_padded[:B, :1]


def init_and_sample_params(key):
    """Deterministic init + one deterministic posterior 'sample'."""
    # TODO(synk): training-time variational resampling / KL term (variational_estimator)
    # has no in-kernel equivalent; weights are sampled once here in plain JAX.
    ks = jax.random.split(key, 8)
    w_ih_mu = 0.1 * jax.random.normal(ks[0], (IN_FEATURES, 4 * HIDDEN), jnp.float32)
    w_hh_mu = 0.1 * jax.random.normal(ks[1], (HIDDEN, 4 * HIDDEN), jnp.float32)
    b_mu = 0.1 * jax.random.normal(ks[2], (4 * HIDDEN,), jnp.float32)
    sigma = jnp.log1p(jnp.exp(jnp.float32(-3.0)))  # softplus(rho)
    w_ih = w_ih_mu + sigma * jax.random.normal(ks[3], w_ih_mu.shape, jnp.float32)
    w_hh = w_hh_mu + sigma * jax.random.normal(ks[4], w_hh_mu.shape, jnp.float32)
    bias = b_mu + sigma * jax.random.normal(ks[5], b_mu.shape, jnp.float32)
    bound = 1.0 / float(jnp.sqrt(jnp.float32(HIDDEN)))
    w_lin = jax.random.uniform(ks[6], (1, HIDDEN), jnp.float32, -bound, bound)
    b_lin = jax.random.uniform(ks[7], (1,), jnp.float32, -bound, bound)
    return w_ih, w_hh, bias, w_lin, b_lin


def reference_forward(x, params):
    """Pure-JAX reference matching the blitz BayesianLSTM forward (f32 matmuls)."""
    w_ih, w_hh, bias, w_lin, b_lin = params
    B, T, _ = x.shape
    H = HIDDEN
    hp = lax.Precision.HIGHEST
    h = jnp.zeros((B, H), jnp.float32)
    c = jnp.zeros((B, H), jnp.float32)
    for t in range(T):
        gates = (jnp.dot(x[:, t, :], w_ih, precision=hp)
                 + jnp.dot(h, w_hh, precision=hp) + bias)
        i = jax.nn.sigmoid(gates[:, :H])
        f = jax.nn.sigmoid(gates[:, H:2 * H])
        g = jnp.tanh(gates[:, 2 * H:3 * H])
        o = jax.nn.sigmoid(gates[:, 3 * H:])
        c = f * c + i * g
        h = o * jnp.tanh(c)
    return jnp.dot(h, w_lin.T, precision=hp) + b_lin


if __name__ == "__main__":
    key = jax.random.PRNGKey(0)
    k_x, k_p = jax.random.split(key)

    B, T = 2, 8
    x = jax.random.normal(k_x, (B, T, IN_FEATURES), jnp.float32)
    params = init_and_sample_params(k_p)

    y = cost_estimation_net_forward(x, params)
    y = jax.block_until_ready(y)

    y_ref = reference_forward(x, params)
    assert y.shape == (B, 1)
    err = float(jnp.max(jnp.abs(y - y_ref)))
    assert err < 2e-3, f"kernel mismatch vs reference: {err}"

    print("KERNEL_OK")
</pallas_src>

<mosaic_0001>
module attributes {stable_mosaic.version = 11 : i64} {
  func.func @_lstm_last_plus_linear_kernel(%arg0: i32, %arg1: memref<8x8x79xf32, #tpu.memory_space<vmem>>, %arg2: memref<79x40xf32, #tpu.memory_space<vmem>>, %arg3: memref<10x40xf32, #tpu.memory_space<vmem>>, %arg4: memref<1x40xf32, #tpu.memory_space<vmem>>, %arg5: memref<10x1xf32, #tpu.memory_space<vmem>>, %arg6: memref<1x1xf32, #tpu.memory_space<vmem>>, %arg7: memref<8x128xf32, #tpu.memory_space<vmem>>) attributes {dimension_semantics = [#tpu.dimension_semantics<parallel>], iteration_bounds = array<i64: 1>, scalar_prefetch = 0 : i64, scratch_operands = 0 : i64, tpu.core_type = #tpu.core_type<tc>, window_params = [{transform_indices = @transform_0, window_bounds = array<i64: 8, 8, 79>}, {pipeline_mode = #tpu.pipeline_mode<synchronous>, transform_indices = @transform_1, window_bounds = array<i64: 79, 40>}, {pipeline_mode = #tpu.pipeline_mode<synchronous>, transform_indices = @transform_2, window_bounds = array<i64: 10, 40>}, {pipeline_mode = #tpu.pipeline_mode<synchronous>, transform_indices = @transform_3, window_bounds = array<i64: 1, 40>}, {pipeline_mode = #tpu.pipeline_mode<synchronous>, transform_indices = @transform_4, window_bounds = array<i64: 10, 1>}, {pipeline_mode = #tpu.pipeline_mode<synchronous>, transform_indices = @transform_5, window_bounds = array<i64: 1, 1>}, {transform_indices = @transform_6, window_bounds = array<i64: 8, 128>}]} {
    %c0 = arith.constant 0 : index
    %c0_0 = arith.constant 0 : index
    %0 = vector.load %arg3[%c0, %c0_0] : memref<10x40xf32, #tpu.memory_space<vmem>>, vector<10x40xf32>
    %c0_1 = arith.constant 0 : index
    %c0_2 = arith.constant 0 : index
    %c0_3 = arith.constant 0 : index
    %1 = vector.load %arg1[%c0_1, %c0_2, %c0_3] : memref<8x8x79xf32, #tpu.memory_space<vmem>>, vector<8x8x79xf32>
    %2 = vector.shape_cast %1 : vector<8x8x79xf32> to vector<64x79xf32>
    %c0_4 = arith.constant 0 : index
    %c0_5 = arith.constant 0 : index
    %3 = vector.load %arg2[%c0_4, %c0_5] : memref<79x40xf32, #tpu.memory_space<vmem>>, vector<79x40xf32>
    %cst = arith.constant dense<0.000000e+00> : vector<64x40xf32>
    %4 = tpu.matmul %2, %3, %cst {dimension_numbers = #tpu.dot_dimension_numbers<[1], [0], [0], [1], [0, 0, 1, 1], [], []>} : vector<64x79xf32>, vector<79x40xf32>, vector<64x40xf32> -> vector<64x40xf32>
    %c0_6 = arith.constant 0 : index
    %c0_7 = arith.constant 0 : index
    %5 = vector.load %arg4[%c0_6, %c0_7] : memref<1x40xf32, #tpu.memory_space<vmem>>, vector<1x40xf32>
    %6 = vector.broadcast %5 : vector<1x40xf32> to vector<64x40xf32>
    %7 = arith.addf %4, %6 : vector<64x40xf32>
    %cst_8 = arith.constant 0.000000e+00 : f32
    %8 = vector.broadcast %cst_8 : f32 to vector<8x10xf32>
    %cst_9 = arith.constant 0.000000e+00 : f32
    %9 = vector.broadcast %cst_9 : f32 to vector<8x10xf32>
    %10 = vector.extract_strided_slice %7 {offsets = [0, 0], sizes = [8, 40], strides = [1, 1]} : vector<64x40xf32> to vector<8x40xf32>
    %cst_10 = arith.constant dense<0.000000e+00> : vector<8x40xf32>
    %11 = tpu.matmul %8, %0, %cst_10 {dimension_numbers = #tpu.dot_dimension_numbers<[1], [0], [0], [1], [0, 0, 1, 1], [], []>} : vector<8x10xf32>, vector<10x40xf32>, vector<8x40xf32> -> vector<8x40xf32>
    %12 = arith.addf %10, %11 : vector<8x40xf32>
    %13 = vector.extract_strided_slice %12 {offsets = [0, 0], sizes = [8, 10], strides = [1, 1]} : vector<8x40xf32> to vector<8x10xf32>
    %14 = arith.negf %13 : vector<8x10xf32>
    %15 = math.exp %14 : vector<8x10xf32>
    %cst_11 = arith.constant 1.000000e+00 : f32
    %16 = vector.broadcast %cst_11 : f32 to vector<8x10xf32>
    %17 = arith.addf %16, %15 : vector<8x10xf32>
    %18 = arith.divf %16, %17 : vector<8x10xf32>
    %19 = vector.extract_strided_slice %12 {offsets = [0, 10], sizes = [8, 10], strides = [1, 1]} : vector<8x40xf32> to vector<8x10xf32>
    %20 = arith.negf %19 : vector<8x10xf32>
    %21 = math.exp %20 : vector<8x10xf32>
    %cst_12 = arith.constant 1.000000e+00 : f32
    %22 = vector.broadcast %cst_12 : f32 to vector<8x10xf32>
    %23 = arith.addf %22, %21 : vector<8x10xf32>
    %24 = arith.divf %22, %23 : vector<8x10xf32>
    %25 = vector.extract_strided_slice %12 {offsets = [0, 20], sizes = [8, 10], strides = [1, 1]} : vector<8x40xf32> to vector<8x10xf32>
    %26 = math.tanh %25 : vector<8x10xf32>
    %27 = vector.extract_strided_slice %12 {offsets = [0, 30], sizes = [8, 10], strides = [1, 1]} : vector<8x40xf32> to vector<8x10xf32>
    %28 = arith.negf %27 : vector<8x10xf32>
    %29 = math.exp %28 : vector<8x10xf32>
    %cst_13 = arith.constant 1.000000e+00 : f32
    %30 = vector.broadcast %cst_13 : f32 to vector<8x10xf32>
    %31 = arith.addf %30, %29 : vector<8x10xf32>
    %32 = arith.divf %30, %31 : vector<8x10xf32>
    %33 = arith.mulf %24, %9 : vector<8x10xf32>
    %34 = arith.mulf %18, %26 : vector<8x10xf32>
    %35 = arith.addf %33, %34 : vector<8x10xf32>
    %36 = math.tanh %35 : vector<8x10xf32>
    %37 = arith.mulf %32, %36 : vector<8x10xf32>
    %38 = vector.extract_strided_slice %7 {offsets = [8, 0], sizes = [8, 40], strides = [1, 1]} : vector<64x40xf32> to vector<8x40xf32>
    %cst_14 = arith.constant dense<0.000000e+00> : vector<8x40xf32>
    %39 = tpu.matmul %37, %0, %cst_14 {dimension_numbers = #tpu.dot_dimension_numbers<[1], [0], [0], [1], [0, 0, 1, 1], [], []>} : vector<8x10xf32>, vector<10x40xf32>, vector<8x40xf32> -> vector<8x40xf32>
    %40 = arith.addf %38, %39 : vector<8x40xf32>
    %41 = vector.extract_strided_slice %40 {offsets = [0, 0], sizes = [8, 10], strides = [1, 1]} : vector<8x40xf32> to vector<8x10xf32>
    %42 = arith.negf %41 : vector<8x10xf32>
    %43 = math.exp %42 : vector<8x10xf32>
    %cst_15 = arith.constant 1.000000e+00 : f32
    %44 = vector.broadcast %cst_15 : f32 to vector<8x10xf32>
    %45 = arith.addf %44, %43 : vector<8x10xf32>
    %46 = arith.divf %44, %45 : vector<8x10xf32>
    %47 = vector.extract_strided_slice %40 {offsets = [0, 10], sizes = [8, 10], strides = [1, 1]} : vector<8x40xf32> to vector<8x10xf32>
    %48 = arith.negf %47 : vector<8x10xf32>
    %49 = math.exp %48 : vector<8x10xf32>
    %cst_16 = arith.constant 1.000000e+00 : f32
    %50 = vector.broadcast %cst_16 : f32 to vector<8x10xf32>
    %51 = arith.addf %50, %49 : vector<8x10xf32>
    %52 = arith.divf %50, %51 : vector<8x10xf32>
    %53 = vector.extract_strided_slice %40 {offsets = [0, 20], sizes = [8, 10], strides = [1, 1]} : vector<8x40xf32> to vector<8x10xf32>
    %54 = math.tanh %53 : vector<8x10xf32>
    %55 = vector.extract_strided_slice %40 {offsets = [0, 30], sizes = [8, 10], strides = [1, 1]} : vector<8x40xf32> to vector<8x10xf32>
    %56 = arith.negf %55 : vector<8x10xf32>
    %57 = math.exp %56 : vector<8x10xf32>
    %cst_17 = arith.constant 1.000000e+00 : f32
    %58 = vector.broadcast %cst_17 : f32 to vector<8x10xf32>
    %59 = arith.addf %58, %57 : vector<8x10xf32>
    %60 = arith.divf %58, %59 : vector<8x10xf32>
    %61 = arith.mulf %52, %35 : vector<8x10xf32>
    %62 = arith.mulf %46, %54 : vector<8x10xf32>
    %63 = arith.addf %61, %62 : vector<8x10xf32>
    %64 = math.tanh %63 : vector<8x10xf32>
    %65 = arith.mulf %60, %64 : vector<8x10xf32>
    %66 = vector.extract_strided_slice %7 {offsets = [16, 0], sizes = [8, 40], strides = [1, 1]} : vector<64x40xf32> to vector<8x40xf32>
    %cst_18 = arith.constant dense<0.000000e+00> : vector<8x40xf32>
    %67 = tpu.matmul %65, %0, %cst_18 {dimension_numbers = #tpu.dot_dimension_numbers<[1], [0], [0], [1], [0, 0, 1, 1], [], []>} : vector<8x10xf32>, vector<10x40xf32>, vector<8x40xf32> -> vector<8x40xf32>
    %68 = arith.addf %66, %67 : vector<8x40xf32>
    %69 = vector.extract_strided_slice %68 {offsets = [0, 0], sizes = [8, 10], strides = [1, 1]} : vector<8x40xf32> to vector<8x10xf32>
    %70 = arith.negf %69 : vector<8x10xf32>
    %71 = math.exp %70 : vector<8x10xf32>
    %cst_19 = arith.constant 1.000000e+00 : f32
    %72 = vector.broadcast %cst_19 : f32 to vector<8x10xf32>
    %73 = arith.addf %72, %71 : vector<8x10xf32>
    %74 = arith.divf %72, %73 : vector<8x10xf32>
    %75 = vector.extract_strided_slice %68 {offsets = [0, 10], sizes = [8, 10], strides = [1, 1]} : vector<8x40xf32> to vector<8x10xf32>
    %76 = arith.negf %75 : vector<8x10xf32>
    %77 = math.exp %76 : vector<8x10xf32>
    %cst_20 = arith.constant 1.000000e+00 : f32
    %78 = vector.broadcast %cst_20 : f32 to vector<8x10xf32>
    %79 = arith.addf %78, %77 : vector<8x10xf32>
    %80 = arith.divf %78, %79 : vector<8x10xf32>
    %81 = vector.extract_strided_slice %68 {offsets = [0, 20], sizes = [8, 10], strides = [1, 1]} : vector<8x40xf32> to vector<8x10xf32>
    %82 = math.tanh %81 : vector<8x10xf32>
    %83 = vector.extract_strided_slice %68 {offsets = [0, 30], sizes = [8, 10], strides = [1, 1]} : vector<8x40xf32> to vector<8x10xf32>
    %84 = arith.negf %83 : vector<8x10xf32>
    %85 = math.exp %84 : vector<8x10xf32>
    %cst_21 = arith.constant 1.000000e+00 : f32
    %86 = vector.broadcast %cst_21 : f32 to vector<8x10xf32>
    %87 = arith.addf %86, %85 : vector<8x10xf32>
    %88 = arith.divf %86, %87 : vector<8x10xf32>
    %89 = arith.mulf %80, %63 : vector<8x10xf32>
    %90 = arith.mulf %74, %82 : vector<8x10xf32>
    %91 = arith.addf %89, %90 : vector<8x10xf32>
    %92 = math.tanh %91 : vector<8x10xf32>
    %93 = arith.mulf %88, %92 : vector<8x10xf32>
    %94 = vector.extract_strided_slice %7 {offsets = [24, 0], sizes = [8, 40], strides = [1, 1]} : vector<64x40xf32> to vector<8x40xf32>
    %cst_22 = arith.constant dense<0.000000e+00> : vector<8x40xf32>
    %95 = tpu.matmul %93, %0, %cst_22 {dimension_numbers = #tpu.dot_dimension_numbers<[1], [0], [0], [1], [0, 0, 1, 1], [], []>} : vector<8x10xf32>, vector<10x40xf32>, vector<8x40xf32> -> vector<8x40xf32>
    %96 = arith.addf %94, %95 : vector<8x40xf32>
    %97 = vector.extract_strided_slice %96 {offsets = [0, 0], sizes = [8, 10], strides = [1, 1]} : vector<8x40xf32> to vector<8x10xf32>
    %98 = arith.negf %97 : vector<8x10xf32>
    %99 = math.exp %98 : vector<8x10xf32>
    %cst_23 = arith.constant 1.000000e+00 : f32
    %100 = vector.broadcast %cst_23 : f32 to vector<8x10xf32>
    %101 = arith.addf %100, %99 : vector<8x10xf32>
    %102 = arith.divf %100, %101 : vector<8x10xf32>
    %103 = vector.extract_strided_slice %96 {offsets = [0, 10], sizes = [8, 10], strides = [1, 1]} : vector<8x40xf32> to vector<8x10xf32>
    %104 = arith.negf %103 : vector<8x10xf32>
    %105 = math.exp %104 : vector<8x10xf32>
    %cst_24 = arith.constant 1.000000e+00 : f32
    %106 = vector.broadcast %cst_24 : f32 to vector<8x10xf32>
    %107 = arith.addf %106, %105 : vector<8x10xf32>
    %108 = arith.divf %106, %107 : vector<8x10xf32>
    %109 = vector.extract_strided_slice %96 {offsets = [0, 20], sizes = [8, 10], strides = [1, 1]} : vector<8x40xf32> to vector<8x10xf32>
    %110 = math.tanh %109 : vector<8x10xf32>
    %111 = vector.extract_strided_slice %96 {offsets = [0, 30], sizes = [8, 10], strides = [1, 1]} : vector<8x40xf32> to vector<8x10xf32>
    %112 = arith.negf %111 : vector<8x10xf32>
    %113 = math.exp %112 : vector<8x10xf32>
    %cst_25 = arith.constant 1.000000e+00 : f32
    %114 = vector.broadcast %cst_25 : f32 to vector<8x10xf32>
    %115 = arith.addf %114, %113 : vector<8x10xf32>
    %116 = arith.divf %114, %115 : vector<8x10xf32>
    %117 = arith.mulf %108, %91 : vector<8x10xf32>
    %118 = arith.mulf %102, %110 : vector<8x10xf32>
    %119 = arith.addf %117, %118 : vector<8x10xf32>
    %120 = math.tanh %119 : vector<8x10xf32>
    %121 = arith.mulf %116, %120 : vector<8x10xf32>
    %122 = vector.extract_strided_slice %7 {offsets = [32, 0], sizes = [8, 40], strides = [1, 1]} : vector<64x40xf32> to vector<8x40xf32>
    %cst_26 = arith.constant dense<0.000000e+00> : vector<8x40xf32>
    %123 = tpu.matmul %121, %0, %cst_26 {dimension_numbers = #tpu.dot_dimension_numbers<[1], [0], [0], [1], [0, 0, 1, 1], [], []>} : vector<8x10xf32>, vector<10x40xf32>, vector<8x40xf32> -> vector<8x40xf32>
    %124 = arith.addf %122, %123 : vector<8x40xf32>
    %125 = vector.extract_strided_slice %124 {offsets = [0, 0], sizes = [8, 10], strides = [1, 1]} : vector<8x40xf32> to vector<8x10xf32>
    %126 = arith.negf %125 : vector<8x10xf32>
    %127 = math.exp %126 : vector<8x10xf32>
    %cst_27 = arith.constant 1.000000e+00 : f32
    %128 = vector.broadcast %cst_27 : f32 to vector<8x10xf32>
    %129 = arith.addf %128, %127 : vector<8x10xf32>
    %130 = arith.divf %128, %129 : vector<8x10xf32>
    %131 = vector.extract_strided_slice %124 {offsets = [0, 10], sizes = [8, 10], strides = [1, 1]} : vector<8x40xf32> to vector<8x10xf32>
    %132 = arith.negf %131 : vector<8x10xf32>
    %133 = math.exp %132 : vector<8x10xf32>
    %cst_28 = arith.constant 1.000000e+00 : f32
    %134 = vector.broadcast %cst_28 : f32 to vector<8x10xf32>
    %135 = arith.addf %134, %133 : vector<8x10xf32>
    %136 = arith.divf %134, %135 : vector<8x10xf32>
    %137 = vector.extract_strided_slice %124 {offsets = [0, 20], sizes = [8, 10], strides = [1, 1]} : vector<8x40xf32> to vector<8x10xf32>
    %138 = math.tanh %137 : vector<8x10xf32>
    %139 = vector.extract_strided_slice %124 {offsets = [0, 30], sizes = [8, 10], strides = [1, 1]} : vector<8x40xf32> to vector<8x10xf32>
    %140 = arith.negf %139 : vector<8x10xf32>
    %141 = math.exp %140 : vector<8x10xf32>
    %cst_29 = arith.constant 1.000000e+00 : f32
    %142 = vector.broadcast %cst_29 : f32 to vector<8x10xf32>
    %143 = arith.addf %142, %141 : vector<8x10xf32>
    %144 = arith.divf %142, %143 : vector<8x10xf32>
    %145 = arith.mulf %136, %119 : vector<8x10xf32>
    %146 = arith.mulf %130, %138 : vector<8x10xf32>
    %147 = arith.addf %145, %146 : vector<8x10xf32>
    %148 = math.tanh %147 : vector<8x10xf32>
    %149 = arith.mulf %144, %148 : vector<8x10xf32>
    %150 = vector.extract_strided_slice %7 {offsets = [40, 0], sizes = [8, 40], strides = [1, 1]} : vector<64x40xf32> to vector<8x40xf32>
    %cst_30 = arith.constant dense<0.000000e+00> : vector<8x40xf32>
    %151 = tpu.matmul %149, %0, %cst_30 {dimension_numbers = #tpu.dot_dimension_numbers<[1], [0], [0], [1], [0, 0, 1, 1], [], []>} : vector<8x10xf32>, vector<10x40xf32>, vector<8x40xf32> -> vector<8x40xf32>
    %152 = arith.addf %150, %151 : vector<8x40xf32>
    %153 = vector.extract_strided_slice %152 {offsets = [0, 0], sizes = [8, 10], strides = [1, 1]} : vector<8x40xf32> to vector<8x10xf32>
    %154 = arith.negf %153 : vector<8x10xf32>
    %155 = math.exp %154 : vector<8x10xf32>
    %cst_31 = arith.constant 1.000000e+00 : f32
    %156 = vector.broadcast %cst_31 : f32 to vector<8x10xf32>
    %157 = arith.addf %156, %155 : vector<8x10xf32>
    %158 = arith.divf %156, %157 : vector<8x10xf32>
    %159 = vector.extract_strided_slice %152 {offsets = [0, 10], sizes = [8, 10], strides = [1, 1]} : vector<8x40xf32> to vector<8x10xf32>
    %160 = arith.negf %159 : vector<8x10xf32>
    %161 = math.exp %160 : vector<8x10xf32>
    %cst_32 = arith.constant 1.000000e+00 : f32
    %162 = vector.broadcast %cst_32 : f32 to vector<8x10xf32>
    %163 = arith.addf %162, %161 : vector<8x10xf32>
    %164 = arith.divf %162, %163 : vector<8x10xf32>
    %165 = vector.extract_strided_slice %152 {offsets = [0, 20], sizes = [8, 10], strides = [1, 1]} : vector<8x40xf32> to vector<8x10xf32>
    %166 = math.tanh %165 : vector<8x10xf32>
    %167 = vector.extract_strided_slice %152 {offsets = [0, 30], sizes = [8, 10], strides = [1, 1]} : vector<8x40xf32> to vector<8x10xf32>
    %168 = arith.negf %167 : vector<8x10xf32>
    %169 = math.exp %168 : vector<8x10xf32>
    %cst_33 = arith.constant 1.000000e+00 : f32
    %170 = vector.broadcast %cst_33 : f32 to vector<8x10xf32>
    %171 = arith.addf %170, %169 : vector<8x10xf32>
    %172 = arith.divf %170, %171 : vector<8x10xf32>
    %173 = arith.mulf %164, %147 : vector<8x10xf32>
    %174 = arith.mulf %158, %166 : vector<8x10xf32>
    %175 = arith.addf %173, %174 : vector<8x10xf32>
    %176 = math.tanh %175 : vector<8x10xf32>
    %177 = arith.mulf %172, %176 : vector<8x10xf32>
    %178 = vector.extract_strided_slice %7 {offsets = [48, 0], sizes = [8, 40], strides = [1, 1]} : vector<64x40xf32> to vector<8x40xf32>
    %cst_34 = arith.constant dense<0.000000e+00> : vector<8x40xf32>
    %179 = tpu.matmul %177, %0, %cst_34 {dimension_numbers = #tpu.dot_dimension_numbers<[1], [0], [0], [1], [0, 0, 1, 1], [], []>} : vector<8x10xf32>, vector<10x40xf32>, vector<8x40xf32> -> vector<8x40xf32>
    %180 = arith.addf %178, %179 : vector<8x40xf32>
    %181 = vector.extract_strided_slice %180 {offsets = [0, 0], sizes = [8, 10], strides = [1, 1]} : vector<8x40xf32> to vector<8x10xf32>
    %182 = arith.negf %181 : vector<8x10xf32>
    %183 = math.exp %182 : vector<8x10xf32>
    %cst_35 = arith.constant 1.000000e+00 : f32
    %184 = vector.broadcast %cst_35 : f32 to vector<8x10xf32>
    %185 = arith.addf %184, %183 : vector<8x10xf32>
    %186 = arith.divf %184, %185 : vector<8x10xf32>
    %187 = vector.extract_strided_slice %180 {offsets = [0, 10], sizes = [8, 10], strides = [1, 1]} : vector<8x40xf32> to vector<8x10xf32>
    %188 = arith.negf %187 : vector<8x10xf32>
    %189 = math.exp %188 : vector<8x10xf32>
    %cst_36 = arith.constant 1.000000e+00 : f32
    %190 = vector.broadcast %cst_36 : f32 to vector<8x10xf32>
    %191 = arith.addf %190, %189 : vector<8x10xf32>
    %192 = arith.divf %190, %191 : vector<8x10xf32>
    %193 = vector.extract_strided_slice %180 {offsets = [0, 20], sizes = [8, 10], strides = [1, 1]} : vector<8x40xf32> to vector<8x10xf32>
    %194 = math.tanh %193 : vector<8x10xf32>
    %195 = vector.extract_strided_slice %180 {offsets = [0, 30], sizes = [8, 10], strides = [1, 1]} : vector<8x40xf32> to vector<8x10xf32>
    %196 = arith.negf %195 : vector<8x10xf32>
    %197 = math.exp %196 : vector<8x10xf32>
    %cst_37 = arith.constant 1.000000e+00 : f32
    %198 = vector.broadcast %cst_37 : f32 to vector<8x10xf32>
    %199 = arith.addf %198, %197 : vector<8x10xf32>
    %200 = arith.divf %198, %199 : vector<8x10xf32>
    %201 = arith.mulf %192, %175 : vector<8x10xf32>
    %202 = arith.mulf %186, %194 : vector<8x10xf32>
    %203 = arith.addf %201, %202 : vector<8x10xf32>
    %204 = math.tanh %203 : vector<8x10xf32>
    %205 = arith.mulf %200, %204 : vector<8x10xf32>
    %206 = vector.extract_strided_slice %7 {offsets = [56, 0], sizes = [8, 40], strides = [1, 1]} : vector<64x40xf32> to vector<8x40xf32>
    %cst_38 = arith.constant dense<0.000000e+00> : vector<8x40xf32>
    %207 = tpu.matmul %205, %0, %cst_38 {dimension_numbers = #tpu.dot_dimension_numbers<[1], [0], [0], [1], [0, 0, 1, 1], [], []>} : vector<8x10xf32>, vector<10x40xf32>, vector<8x40xf32> -> vector<8x40xf32>
    %208 = arith.addf %206, %207 : vector<8x40xf32>
    %209 = vector.extract_strided_slice %208 {offsets = [0, 0], sizes = [8, 10], strides = [1, 1]} : vector<8x40xf32> to vector<8x10xf32>
    %210 = arith.negf %209 : vector<8x10xf32>
    %211 = math.exp %210 : vector<8x10xf32>
    %cst_39 = arith.constant 1.000000e+00 : f32
    %212 = vector.broadcast %cst_39 : f32 to vector<8x10xf32>
    %213 = arith.addf %212, %211 : vector<8x10xf32>
    %214 = arith.divf %212, %213 : vector<8x10xf32>
    %215 = vector.extract_strided_slice %208 {offsets = [0, 10], sizes = [8, 10], strides = [1, 1]} : vector<8x40xf32> to vector<8x10xf32>
    %216 = arith.negf %215 : vector<8x10xf32>
    %217 = math.exp %216 : vector<8x10xf32>
    %cst_40 = arith.constant 1.000000e+00 : f32
    %218 = vector.broadcast %cst_40 : f32 to vector<8x10xf32>
    %219 = arith.addf %218, %217 : vector<8x10xf32>
    %220 = arith.divf %218, %219 : vector<8x10xf32>
    %221 = vector.extract_strided_slice %208 {offsets = [0, 20], sizes = [8, 10], strides = [1, 1]} : vector<8x40xf32> to vector<8x10xf32>
    %222 = math.tanh %221 : vector<8x10xf32>
    %223 = vector.extract_strided_slice %208 {offsets = [0, 30], sizes = [8, 10], strides = [1, 1]} : vector<8x40xf32> to vector<8x10xf32>
    %224 = arith.negf %223 : vector<8x10xf32>
    %225 = math.exp %224 : vector<8x10xf32>
    %cst_41 = arith.constant 1.000000e+00 : f32
    %226 = vector.broadcast %cst_41 : f32 to vector<8x10xf32>
    %227 = arith.addf %226, %225 : vector<8x10xf32>
    %228 = arith.divf %226, %227 : vector<8x10xf32>
    %229 = arith.mulf %220, %203 : vector<8x10xf32>
    %230 = arith.mulf %214, %222 : vector<8x10xf32>
    %231 = arith.addf %229, %230 : vector<8x10xf32>
    %232 = math.tanh %231 : vector<8x10xf32>
    %233 = arith.mulf %228, %232 : vector<8x10xf32>
    %c0_42 = arith.constant 0 : index
    %c0_43 = arith.constant 0 : index
    %234 = vector.load %arg5[%c0_42, %c0_43] : memref<10x1xf32, #tpu.memory_space<vmem>>, vector<10x1xf32>
    %cst_44 = arith.constant dense<0.000000e+00> : vector<8x1xf32>
    %235 = tpu.matmul %233, %234, %cst_44 {dimension_numbers = #tpu.dot_dimension_numbers<[1], [0], [0], [1], [0, 0, 1, 1], [], []>} : vector<8x10xf32>, vector<10x1xf32>, vector<8x1xf32> -> vector<8x1xf32>
    %c0_45 = arith.constant 0 : index
    %c0_46 = arith.constant 0 : index
    %236 = vector.load %arg6[%c0_45, %c0_46] : memref<1x1xf32, #tpu.memory_space<vmem>>, vector<1x1xf32>
    %237 = vector.broadcast %236 : vector<1x1xf32> to vector<8x1xf32>
    %238 = arith.addf %235, %237 : vector<8x1xf32>
    %239 = vector.shape_cast %238 : vector<8x1xf32> to vector<8x1xf32>
    %240 = vector.broadcast %239 : vector<8x1xf32> to vector<8x128xf32>
    %c0_47 = arith.constant 0 : index
    %c0_48 = arith.constant 0 : index
    %241 = vector.load %arg7[%c0_47, %c0_48] : memref<8x128xf32, #tpu.memory_space<vmem>>, vector<8x128xf32>
    tpu.vector_store %arg7[%c0_47, %c0_48], %240 {strides = array<i32>} : memref<8x128xf32, #tpu.memory_space<vmem>>, vector<8x128xf32>,
    return
  }
  func.func @transform_0(%arg0: i32) -> (i32, i32, i32) {
    %c0_i32 = arith.constant 0 : i32
    %c0_i32_0 = arith.constant 0 : i32
    %c0_i32_1 = arith.constant 0 : i32
    return %c0_i32, %arg0, %c0_i32_0 : i32, i32, i32
  }
  func.func @transform_1(%arg0: i32) -> (i32, i32) {
    %c0_i32 = arith.constant 0 : i32
    %c0_i32_0 = arith.constant 0 : i32
    %c0_i32_1 = arith.constant 0 : i32
    return %c0_i32, %c0_i32_0 : i32, i32
  }
  func.func @transform_2(%arg0: i32) -> (i32, i32) {
    %c0_i32 = arith.constant 0 : i32
    %c0_i32_0 = arith.constant 0 : i32
    %c0_i32_1 = arith.constant 0 : i32
    return %c0_i32, %c0_i32_0 : i32, i32
  }
  func.func @transform_3(%arg0: i32) -> (i32, i32) {
    %c0_i32 = arith.constant 0 : i32
    %c0_i32_0 = arith.constant 0 : i32
    %c0_i32_1 = arith.constant 0 : i32
    return %c0_i32, %c0_i32_0 : i32, i32
  }
  func.func @transform_4(%arg0: i32) -> (i32, i32) {
    %c0_i32 = arith.constant 0 : i32
    %c0_i32_0 = arith.constant 0 : i32
    %c0_i32_1 = arith.constant 0 : i32
    return %c0_i32, %c0_i32_0 : i32, i32
  }
  func.func @transform_5(%arg0: i32) -> (i32, i32) {
    %c0_i32 = arith.constant 0 : i32
    %c0_i32_0 = arith.constant 0 : i32
    %c0_i32_1 = arith.constant 0 : i32
    return %c0_i32, %c0_i32_0 : i32, i32
  }
  func.func @transform_6(%arg0: i32) -> (i32, i32) {
    %c0_i32 = arith.constant 0 : i32
    %c0_i32_0 = arith.constant 0 : i32
    return %arg0, %c0_i32 : i32, i32
  }
}

</mosaic_0001>

<bundles_post_ra>
// kernel: tpu_custom_call.1
= control target key start
LH: loop header
LB: loop body
LE: loop exit
PB: predicated region body
PF: predicated region fallthrough
CT: control target
= control target key end

     0   :  { %s1610_s0 = inlined_call_operand.vmem [shape: f32[8,8,79], index: 0, kind: input, shape index: {}]   ;;  %s1611_s1 = inlined_call_operand.vmem [shape: f32[79,40], index: 1, kind: input, shape index: {}]   ;;  %s1612_s2 = inlined_call_operand.vmem [shape: f32[10,40], index: 2, kind: input, shape index: {}]   ;;  %s1613_s3 = inlined_call_operand.vmem [shape: f32[1,40], index: 3, kind: input, shape index: {}]   ;;  %s1614_s4 = inlined_call_operand.vmem [shape: f32[10,1], index: 4, kind: input, shape index: {}]   ;;  %s1615_s5 = inlined_call_operand.<no memory space> [shape: f32[1,1], index: 5, kind: input, shape index: {}]   ;;  %s1616_s6 = inlined_call_operand.hbm [shape: f32[8,128], index: 6, kind: output, shape index: {}]  }
   0x1   :  { %v11_v0 = vstv %s1615_s5 }
   0x2   :  { %12 = vst [vmem:[#allocation2] sm:$0x1] %v11_v0 }
   0x3   :  { %v45_v1 = vld [vmem:[%s1611_s1 + $0x48] sm:$0x7f]  ;;  %vm78_vm0 = vcmask 1046528   ;;  %v44_v2 = vld [vmem:[%s1611_s1 + $0x40] sm:$0xff]  ;;  %v1368_v3 = vmov 0.0   ;;  %vm53_vm1 = vcmask 646144  }
   0x4   :  { %1178 = vmatprep.subr.msk.mxu0 %vm78_vm0, %v45_v1  ;;  %1210 = vmatprep.subr.mxu1 %v1368_v3  ;;  %v43_v4 = vld [vmem:[%s1611_s1 + $0x38] sm:$0xff]  ;;  %vm191_vm2 = vcmask 1041408   ;;  %vm1369_vm3 = vmmov 0   ;;  %v28_v5 = vld [vmem:[%s1610_s0] sm:$0xff]  ;;  %v1432_v6 = vld [vmem:[%s1612_s2 + $0x8] sm:$0x3] }
   0x5   :  { %1179 = vmatpush3.msk.msra.mxu0 %vm78_vm0, %v45_v1  ;;  %1214 = vmatprep.mubr.msk.f32.mxu1 %vm1369_vm3, %v1368_v3  ;;  %v42_v7 = vld [vmem:[%s1611_s1 + $0x30] sm:$0xff]  ;;  %v1441_v8 = vld [vmem:[%s1612_s2] sm:$0xff] }
   0x6   :  { %1180 = vmatprep.subr.mxu0 %v44_v2  ;;  %1198 = vmatprep.mubr.msk.f32.mxu0 %vm53_vm1, %v28_v5 }
   0x7   :  { %1181 = vmatpush3.msra.mxu0 %v44_v2 }
   0x8   :  { %13 = vsyncpa [#allocation4], 0  ;;  %1182 = vmatprep.subr.mxu0 %v43_v4  ;;  %1211 = vmatpush3.msk.msra.mxu1 %vm191_vm2, %v1432_v6  ;;  %v41_v9 = vld [vmem:[%s1611_s1 + $0x28] sm:$0xff]  ;;  %v40_v10 = vld [vmem:[%s1611_s1 + $0x20] sm:$0xff]  ;;  %s1371_s27 = smov 10   ;;  %s1373_s28 = smov 98  }
   0x9   :  { %1183 = vmatpush3.msra.mxu0 %v43_v4  ;;  %1212 = vmatprep.subr.mxu1 %v1368_v3  ;;  %v39_v11 = vld [vmem:[%s1611_s1 + $0x18] sm:$0xff]  ;;  %v38_v12 = vld [vmem:[%s1611_s1 + $0x10] sm:$0xff]  ;;  %v37_v13 = vld [vmem:[%s1611_s1 + $0x8] sm:$0xff]  ;;  %vm187_vm4 = vcmask 80896  }
   0xa   :  { %1184 = vmatprep.subr.mxu0 %v42_v7  ;;  %1213 = vmatpush3.msra.mxu1 %v1441_v8  ;;  %v36_v14 = vld [vmem:[%s1611_s1] sm:$0xff]  ;;  %v29_v15 = vld [vmem:[%s1610_s0 + $0x8] sm:$0xff]  ;;  %s1370_s1 = smov 108   ;;  %v30_v51 = vld [vmem:[%s1610_s0 + $0x10] sm:$0xff] }
   0xb   :  { %1185 = vmatpush3.msra.mxu0 %v42_v7  ;;  %1215 = vmatmul.mubr.f32.vlgmr.msra.gmra.mxu1 %v1368_v3  ;;  %v1482_v19 = vld [vmem:[%s1613_s3] ss:$0 sm:$0xff]  ;;  %s1372_s3 = smov 20   ;;  %v31_v52 = vld [vmem:[%s1610_s0 + $0x18] sm:$0xff] }
   0xc   :  { %1186 = vmatprep.subr.mxu0 %v41_v9  ;;  %1217 = vmatprep.subr.mxu1 %v1368_v3 }
   0xd   :  { %1187 = vmatpush3.msra.mxu0 %v41_v9  ;;  %1218 = vmatpush3.msk.msra.mxu1 %vm191_vm2, %v1432_v6 }
   0xe   :  { %1188 = vmatprep.subr.mxu0 %v40_v10  ;;  %1219 = vmatprep.subr.mxu1 %v1368_v3 }
   0xf   :  { %1189 = vmatpush3.msra.mxu0 %v40_v10  ;;  %1220 = vmatpush3.msra.mxu1 %v1441_v8 }
  0x10   :  { %1190 = vmatprep.subr.mxu0 %v39_v11  ;;  %1221 = vmatprep.mubr.msk.f32.mxu1 %vm1369_vm3, %v1368_v3 }
  0x11   :  { %1191 = vmatpush3.msra.mxu0 %v39_v11  ;;  %1224 = vmatprep.subr.mxu1 %v1368_v3 }
  0x12   :  { %1192 = vmatprep.subr.mxu0 %v38_v12 }
  0x13   :  { %1193 = vmatpush3.msra.mxu0 %v38_v12 }
  0x14   :  { %1194 = vmatprep.subr.mxu0 %v37_v13 }
  0x15   :  { %1195 = vmatpush3.msra.mxu0 %v37_v13 }
  0x16   :  { %1196 = vmatprep.subr.mxu0 %v36_v14 }
  0x17   :  { %1197 = vmatpush3.msra.mxu0 %v36_v14 }
  0x18   :  { %1199 = vmatmul.mubr.msk.f32.vlgmr.msra.gmra.mxu0 %vm53_vm1, %v29_v15  ;;  %1266 = vmatprep.subr.mxu0 %v1368_v3 }
  0x19   :  { %1201 = vmatprep.mubr.msk.f32.mxu0 %vm53_vm1, %v30_v51 }
  0x1c   :  { %1202 = vmatmul.mubr.msk.f32.gmra.mxu0 %vm53_vm1, %v31_v52 }
  0xcb   :  { %v261_v16 = vpop.f32.mrf.mxu1 }
  0xcd   :  { %v1216_v17 = vpop.f32.mrf.mxu1 }
  0xd8   :  { %v1200_v18 = vpop.f32.mrf.mxu0 }
  0xd9   :  { %v154_v37 = vadd.f32 %v1200_v18, %v1482_v19 }
  0xda   :  { %v148_v20 = vpop.f32.mrf.mxu0 }
  0xdb   :  { %v149_v21 = vadd.f32 %v1482_v19, %v148_v20 }
  0xdc   :  { %v1203_v57 = vpop.f32.mrf.mxu0 }
  0xdd   :  { %v265_v22 = vadd.f32 %v261_v16, %v149_v21  ;;  %v164_v16 = vadd.f32 %v1203_v57, %v1482_v19 }
  0xde   :  { %v158_v58 = vpop.f32.mrf.mxu0 }
  0xdf   :  { %1282 = vtanh.f32 %v265_v22  ;;  %v1108_v24 = vmul.f32 -1.442695, %v265_v22  ;;  %v159_v59 = vadd.f32 %v1482_v19, %v158_v58 }
  0xe1   :  { %1284 = vpow2.f32 %v1108_v24 }
  0xec   :  { %v1283_v23 = vpop.eup %1282 }
  0xed   :  { %275 = vrot.lane.b32.xlu0 %v1283_v23, %s1370_s1 }
  0xee   :  { %v1285_v25 = vpop.eup %1284 }
  0xef   :  { %v269_v26 = vadd.f32 1.0, %v1285_v25 }
  0xf1   :  { %1286 = vrcp.f32 %v269_v26 }
  0xfe   :  { %v1287_v27 = vpop.eup %1286 }
  0xff   :  { %v273_v30 = vmul.f32 0.0, %v1287_v27 }
 0x15f   :  { %v276_v28 = vpop.permute.xlu0 %275 }
 0x160   :  { %v278_v29 = vmul.f32 %v1287_v27, %v276_v28 }
 0x162   :  { %280 = vrot.lane.b32.xlu0 %v278_v29, %s1371_s27 }
 0x1d4   :  { %v281_v31 = vpop.permute.xlu0 %280 }
 0x1d5   :  { %v283_v32 = vadd.f32 %v281_v31, %v273_v30  ;;  %v32_v31 = vld [vmem:[%s1610_s0 + $0x20] sm:$0xff] }
 0x1d6   :  { %1204 = vmatprep.mubr.msk.f32.mxu0 %vm53_vm1, %v32_v31 }
 0x1d7   :  { %1288 = vtanh.f32 %v283_v32 }
 0x1e4   :  { %v1289_v33 = vpop.eup %1288 }
 0x1e5   :  { %286 = vrot.lane.b32.xlu1 %v1289_v33, %s1372_s3 }
 0x257   :  { %v287_v34 = vpop.permute.xlu1 %286 }
 0x258   :  { %v289_v35 = vmul.f32 %v1287_v27, %v287_v34 }
 0x25a   :  { %291 = vrot.lane.b32.xlu1 %v289_v35, %s1373_s28 }
 0x2cc   :  { %v292_v36 = vpop.permute.xlu1 %291 }
 0x2cd   :  { %1222 = vmatmul.mubr.msk.f32.vlgmr.msra.gmra.mxu1 %vm187_vm4, %v292_v36 }
 0x2ce   :  { %1225 = vmatpush3.msk.msra.mxu1 %vm191_vm2, %v1432_v6  ;;  %1228 = vmatprep.mubr.msk.f32.mxu1 %vm1369_vm3, %v1368_v3 }
 0x2cf   :  { %1226 = vmatprep.subr.mxu1 %v1368_v3 }
 0x2d0   :  { %1227 = vmatpush3.msra.mxu1 %v1441_v8 }
 0x2d1   :  { %1231 = vmatprep.subr.mxu1 %v1368_v3 }
 0x38d   :  { %v361_v38 = vpop.f32.mrf.mxu1 }
 0x38e   :  { %v365_v39 = vadd.f32 %v361_v38, %v154_v37 }
 0x38f   :  { %v1223_v40 = vpop.f32.mrf.mxu1 }
 0x390   :  { %1290 = vtanh.f32 %v365_v39  ;;  %v1111_v42 = vmul.f32 -1.442695, %v365_v39 }
 0x392   :  { %1292 = vpow2.f32 %v1111_v42 }
 0x39d   :  { %v1291_v41 = vpop.eup %1290 }
 0x39e   :  { %375 = vrot.lane.b32.xlu0 %v1291_v41, %s1370_s1 }
 0x39f   :  { %v1293_v43 = vpop.eup %1292 }
 0x3a0   :  { %v369_v44 = vadd.f32 1.0, %v1293_v43 }
 0x3a2   :  { %1294 = vrcp.f32 %v369_v44 }
 0x3af   :  { %v1295_v45 = vpop.eup %1294 }
 0x3b0   :  { %v373_v48 = vmul.f32 %v1295_v45, %v283_v32  ;;  %v33_v32 = vld [vmem:[%s1610_s0 + $0x28] sm:$0xff] }
 0x3b1   :  { %1205 = vmatmul.mubr.msk.f32.gmra.mxu0 %vm53_vm1, %v33_v32 }
 0x410   :  { %v376_v46 = vpop.permute.xlu0 %375 }
 0x411   :  { %v378_v47 = vmul.f32 %v1295_v45, %v376_v46 }
 0x413   :  { %380 = vrot.lane.b32.xlu1 %v378_v47, %s1371_s27 }
 0x471   :  { %v1206_v37 = vpop.f32.mrf.mxu0 }
 0x472   :  { %v174_v57 = vadd.f32 %v1206_v37, %v1482_v19 }
 0x473   :  { %v168_v38 = vpop.f32.mrf.mxu0 }
 0x474   :  { %v169_v39 = vadd.f32 %v1482_v19, %v168_v38 }
 0x485   :  { %v381_v49 = vpop.permute.xlu1 %380 }
 0x486   :  { %v383_v50 = vadd.f32 %v381_v49, %v373_v48 }
 0x488   :  { %1296 = vtanh.f32 %v383_v50 }
 0x495   :  { %v1297_v53 = vpop.eup %1296 }
 0x496   :  { %386 = vrot.lane.b32.xlu0 %v1297_v53, %s1372_s3 }
 0x508   :  { %v387_v54 = vpop.permute.xlu0 %386 }
 0x509   :  { %v389_v55 = vmul.f32 %v1295_v45, %v387_v54 }
 0x50b   :  { %391 = vrot.lane.b32.xlu1 %v389_v55, %s1373_s28 }
 0x57d   :  { %v392_v56 = vpop.permute.xlu1 %391 }
 0x57e   :  { %1229 = vmatmul.mubr.msk.f32.vlgmr.msra.gmra.mxu1 %vm187_vm4, %v392_v56 }
 0x57f   :  { %1232 = vmatpush3.msk.msra.mxu1 %vm191_vm2, %v1432_v6  ;;  %1235 = vmatprep.mubr.msk.f32.mxu1 %vm1369_vm3, %v1368_v3 }
 0x580   :  { %1233 = vmatprep.subr.mxu1 %v1368_v3 }
 0x581   :  { %1234 = vmatpush3.msra.mxu1 %v1441_v8 }
 0x582   :  { %1238 = vmatprep.subr.mxu1 %v1368_v3 }
 0x63e   :  { %v461_v60 = vpop.f32.mrf.mxu1 }
 0x63f   :  { %v465_v61 = vadd.f32 %v461_v60, %v159_v59 }
 0x640   :  { %v1230_v62 = vpop.f32.mrf.mxu1 }
 0x641   :  { %1298 = vtanh.f32 %v465_v61  ;;  %v1114_v0 = vmul.f32 -1.442695, %v465_v61 }
 0x643   :  { %1300 = vpow2.f32 %v1114_v0 }
 0x64e   :  { %v1299_v63 = vpop.eup %1298 }
 0x64f   :  { %475 = vrot.lane.b32.xlu0 %v1299_v63, %s1370_s1 }
 0x650   :  { %v1301_v1 = vpop.eup %1300 }
 0x651   :  { %v469_v2 = vadd.f32 1.0, %v1301_v1 }
 0x653   :  { %1302 = vrcp.f32 %v469_v2 }
 0x660   :  { %v1303_v4 = vpop.eup %1302 }
 0x661   :  { %v473_v9 = vmul.f32 %v1303_v4, %v383_v50 }
 0x6c1   :  { %v476_v5 = vpop.permute.xlu0 %475 }
 0x6c2   :  { %v478_v7 = vmul.f32 %v1303_v4, %v476_v5 }
 0x6c4   :  { %480 = vrot.lane.b32.xlu1 %v478_v7, %s1371_s27 }
 0x736   :  { %v481_v10 = vpop.permute.xlu1 %480 }
 0x737   :  { %v483_v11 = vadd.f32 %v481_v10, %v473_v9  ;;  %v34_v10 = vld [vmem:[%s1610_s0 + $0x30] sm:$0xff] }
 0x738   :  { %1207 = vmatprep.mubr.msk.f32.mxu0 %vm53_vm1, %v34_v10 }
 0x739   :  { %1304 = vtanh.f32 %v483_v11 }
 0x746   :  { %v1305_v12 = vpop.eup %1304 }
 0x747   :  { %486 = vrot.lane.b32.xlu0 %v1305_v12, %s1372_s3 }
 0x7b9   :  { %v487_v13 = vpop.permute.xlu0 %486 }
 0x7ba   :  { %v489_v14 = vmul.f32 %v1303_v4, %v487_v13 }
 0x7bc   :  { %491 = vrot.lane.b32.xlu1 %v489_v14, %s1373_s28 }
 0x82e   :  { %v492_v15 = vpop.permute.xlu1 %491 }
 0x82f   :  { %1236 = vmatmul.mubr.msk.f32.vlgmr.msra.gmra.mxu1 %vm187_vm4, %v492_v15 }
 0x830   :  { %1239 = vmatpush3.msk.msra.mxu1 %vm191_vm2, %v1432_v6  ;;  %1242 = vmatprep.mubr.msk.f32.mxu1 %vm1369_vm3, %v1368_v3 }
 0x831   :  { %1240 = vmatprep.subr.mxu1 %v1368_v3 }
 0x832   :  { %1241 = vmatpush3.msra.mxu1 %v1441_v8 }
 0x833   :  { %1245 = vmatprep.subr.mxu1 %v1368_v3 }
 0x8ef   :  { %v561_v17 = vpop.f32.mrf.mxu1 }
 0x8f0   :  { %v565_v18 = vadd.f32 %v561_v17, %v164_v16 }
 0x8f1   :  { %v1237_v20 = vpop.f32.mrf.mxu1 }
 0x8f2   :  { %1306 = vtanh.f32 %v565_v18  ;;  %v1117_v22 = vmul.f32 -1.442695, %v565_v18 }
 0x8f4   :  { %1308 = vpow2.f32 %v1117_v22 }
 0x8ff   :  { %v1307_v21 = vpop.eup %1306 }
 0x900   :  { %575 = vrot.lane.b32.xlu0 %v1307_v21, %s1370_s1 }
 0x901   :  { %v1309_v23 = vpop.eup %1308 }
 0x902   :  { %v569_v24 = vadd.f32 1.0, %v1309_v23 }
 0x904   :  { %1310 = vrcp.f32 %v569_v24 }
 0x911   :  { %v1311_v25 = vpop.eup %1310 }
 0x912   :  { %v573_v28 = vmul.f32 %v1311_v25, %v483_v11  ;;  %v35_v11 = vld [vmem:[%s1610_s0 + $0x38] sm:$0xff] }
 0x913   :  { %1208 = vmatmul.mubr.msk.f32.gmra.mxu0 %vm53_vm1, %v35_v11 }
 0x914   :  { %1270 = vmatprep.mubr.msk.f32.mxu0 %vm1369_vm3, %v1368_v3 }
 0x972   :  { %v576_v26 = vpop.permute.xlu0 %575 }
 0x973   :  { %v578_v27 = vmul.f32 %v1311_v25, %v576_v26 }
 0x975   :  { %580 = vrot.lane.b32.xlu1 %v578_v27, %s1371_s27 }
 0x9d3   :  { %v1209_v16 = vpop.f32.mrf.mxu0 }
 0x9d5   :  { %v178_v17 = vpop.f32.mrf.mxu0 }
 0x9d6   :  { %v179_v18 = vadd.f32 %v1482_v19, %v178_v17 }
 0x9e7   :  { %v581_v29 = vpop.permute.xlu1 %580 }
 0x9e8   :  { %v583_v30 = vadd.f32 %v581_v29, %v573_v28 }
 0x9ea   :  { %1312 = vtanh.f32 %v583_v30 }
 0x9f7   :  { %v1313_v33 = vpop.eup %1312 }
 0x9f8   :  { %586 = vrot.lane.b32.xlu0 %v1313_v33, %s1372_s3 }
 0xa6a   :  { %v587_v34 = vpop.permute.xlu0 %586 }
 0xa6b   :  { %v589_v35 = vmul.f32 %v1311_v25, %v587_v34 }
 0xa6d   :  { %591 = vrot.lane.b32.xlu1 %v589_v35, %s1373_s28  ;;  %v184_v35 = vadd.f32 %v1209_v16, %v1482_v19 }
 0xadf   :  { %v592_v36 = vpop.permute.xlu1 %591 }
 0xae0   :  { %1243 = vmatmul.mubr.msk.f32.vlgmr.msra.gmra.mxu1 %vm187_vm4, %v592_v36 }
 0xae1   :  { %1246 = vmatpush3.msk.msra.mxu1 %vm191_vm2, %v1432_v6  ;;  %1249 = vmatprep.mubr.msk.f32.mxu1 %vm1369_vm3, %v1368_v3 }
 0xae2   :  { %1247 = vmatprep.subr.mxu1 %v1368_v3 }
 0xae3   :  { %1248 = vmatpush3.msra.mxu1 %v1441_v8 }
 0xae4   :  { %1252 = vmatprep.subr.mxu1 %v1368_v3 }
 0xba0   :  { %v661_v40 = vpop.f32.mrf.mxu1 }
 0xba1   :  { %v665_v41 = vadd.f32 %v661_v40, %v169_v39 }
 0xba2   :  { %v1244_v42 = vpop.f32.mrf.mxu1 }
 0xba3   :  { %1314 = vtanh.f32 %v665_v41  ;;  %v1120_v44 = vmul.f32 -1.442695, %v665_v41 }
 0xba5   :  { %1316 = vpow2.f32 %v1120_v44 }
 0xbb0   :  { %v1315_v43 = vpop.eup %1314 }
 0xbb1   :  { %675 = vrot.lane.b32.xlu0 %v1315_v43, %s1370_s1 }
 0xbb2   :  { %v1317_v45 = vpop.eup %1316 }
 0xbb3   :  { %v669_v46 = vadd.f32 1.0, %v1317_v45 }
 0xbb5   :  { %1318 = vrcp.f32 %v669_v46 }
 0xbc2   :  { %v1319_v47 = vpop.eup %1318 }
 0xbc3   :  { %v673_v50 = vmul.f32 %v1319_v47, %v583_v30 }
 0xc23   :  { %v676_v48 = vpop.permute.xlu0 %675 }
 0xc24   :  { %v678_v49 = vmul.f32 %v1319_v47, %v676_v48  ;;  %v991_v48 = vld [vmem:[%s1614_s4 + $0x8] sm:$0x3] }
 0xc25   :  { %1267 = vmatpush3.msk.msra.mxu0 %vm191_vm2, %v991_v48 }
 0xc26   :  { %680 = vrot.lane.b32.xlu1 %v678_v49, %s1371_s27  ;;  %v990_v49 = vld [vmem:[%s1614_s4] sm:$0xff]  ;;  %1268 = vmatprep.subr.mxu0 %v1368_v3  ;;  %s1375_s4 = smov [#allocation3]  }
 0xc27   :  { %1269 = vmatpush3.msra.mxu0 %v990_v49  ;;  %s1089_s18 = sshll.u32 %s1375_s4, 4  ;;  %s1090_s18 = int_to_ptr.vmem [resolvable:$true] %s1089_s18 }
 0xc28   :  { %s1346_s19 = scalar_lea.vmem %s1090_s18, 128  ;;  %p1351_p1 = scmp.lt.s32.totalorder %s1090_s18, %s1090_s18 }
 0xc29   :  { %p1347_p0 = scmp.ne.s32.totalorder %s1090_s18, %s1346_s19  ;;  %p1352_p2 = scmp.lt.s32.totalorder %s1346_s19, %s1346_s19 }
 0xc2b   :  { %p1353_p3 = por %p1352_p2, %p1351_p1 }
 0xc2d   :  { %p1354_p4 = pnand %p1353_p3, %p1347_p0 }
 0xc98   :  { %v681_v51 = vpop.permute.xlu1 %680 }
 0xc99   :  { %v683_v52 = vadd.f32 %v681_v51, %v673_v50 }
 0xc9b   :  { %1320 = vtanh.f32 %v683_v52 }
 0xca8   :  { %v1321_v53 = vpop.eup %1320 }
 0xca9   :  { %686 = vrot.lane.b32.xlu0 %v1321_v53, %s1372_s3 }
 0xd1b   :  { %v687_v54 = vpop.permute.xlu0 %686 }
 0xd1c   :  { %v689_v55 = vmul.f32 %v1319_v47, %v687_v54  ;;  %v1374_v54 = vmov 0  }
 0xd1d   :  { %1281 = vset.pattern.permute.xlu0 %v1374_v54 }
 0xd1e   :  { %691 = vrot.lane.b32.xlu1 %v689_v55, %s1373_s28  ;;  %v1130_v55 = vld [vmem:[#allocation2] ss:$0 sm:$0xff] }
 0xd90   :  { %v692_v56 = vpop.permute.xlu1 %691 }
 0xd91   :  { %1250 = vmatmul.mubr.msk.f32.vlgmr.msra.gmra.mxu1 %vm187_vm4, %v692_v56 }
 0xd92   :  { %1253 = vmatpush3.msk.msra.mxu1 %vm191_vm2, %v1432_v6  ;;  %1256 = vmatprep.mubr.msk.f32.mxu1 %vm1369_vm3, %v1368_v3 }
 0xd93   :  { %1254 = vmatprep.subr.mxu1 %v1368_v3 }
 0xd94   :  { %1255 = vmatpush3.msra.mxu1 %v1441_v8 }
 0xd95   :  { %1259 = vmatprep.subr.mxu1 %v1368_v3 }
 0xe51   :  { %v761_v58 = vpop.f32.mrf.mxu1 }
 0xe52   :  { %v765_v59 = vadd.f32 %v761_v58, %v174_v57 }
 0xe53   :  { %v1251_v60 = vpop.f32.mrf.mxu1 }
 0xe54   :  { %1322 = vtanh.f32 %v765_v59  ;;  %v1123_v62 = vmul.f32 -1.442695, %v765_v59 }
 0xe56   :  { %1324 = vpow2.f32 %v1123_v62 }
 0xe61   :  { %v1323_v61 = vpop.eup %1322 }
 0xe62   :  { %775 = vrot.lane.b32.xlu0 %v1323_v61, %s1370_s1 }
 0xe63   :  { %v1325_v63 = vpop.eup %1324 }
 0xe64   :  { %v769_v0 = vadd.f32 1.0, %v1325_v63 }
 0xe66   :  { %1326 = vrcp.f32 %v769_v0 }
 0xe73   :  { %v1327_v1 = vpop.eup %1326 }
 0xe74   :  { %v773_v5 = vmul.f32 %v1327_v1, %v683_v52 }
 0xed4   :  { %v776_v2 = vpop.permute.xlu0 %775 }
 0xed5   :  { %v778_v4 = vmul.f32 %v1327_v1, %v776_v2 }
 0xed7   :  { %780 = vrot.lane.b32.xlu1 %v778_v4, %s1371_s27 }
 0xf49   :  { %v781_v7 = vpop.permute.xlu1 %780 }
 0xf4a   :  { %v783_v9 = vadd.f32 %v781_v7, %v773_v5 }
 0xf4c   :  { %1328 = vtanh.f32 %v783_v9 }
 0xf59   :  { %v1329_v12 = vpop.eup %1328 }
 0xf5a   :  { %786 = vrot.lane.b32.xlu0 %v1329_v12, %s1372_s3 }
 0xfcc   :  { %v787_v13 = vpop.permute.xlu0 %786 }
 0xfcd   :  { %v789_v14 = vmul.f32 %v1327_v1, %v787_v13 }
 0xfcf   :  { %791 = vrot.lane.b32.xlu1 %v789_v14, %s1373_s28 }
0x1041   :  { %v792_v15 = vpop.permute.xlu1 %791 }
0x1042   :  { %1257 = vmatmul.mubr.msk.f32.vlgmr.msra.gmra.mxu1 %vm187_vm4, %v792_v15 }
0x1043   :  { %1260 = vmatpush3.msk.msra.mxu1 %vm191_vm2, %v1432_v6  ;;  %1263 = vmatprep.mubr.msk.f32.mxu1 %vm1369_vm3, %v1368_v3 }
0x1044   :  { %1261 = vmatprep.subr.mxu1 %v1368_v3 }
0x1045   :  { %1262 = vmatpush3.msra.mxu1 %v1441_v8 }
0x1102   :  { %v861_v20 = vpop.f32.mrf.mxu1 }
0x1103   :  { %v865_v21 = vadd.f32 %v861_v20, %v179_v18 }
0x1104   :  { %v1258_v22 = vpop.f32.mrf.mxu1 }
0x1105   :  { %1330 = vtanh.f32 %v865_v21  ;;  %v1126_v24 = vmul.f32 -1.442695, %v865_v21 }
0x1107   :  { %1332 = vpow2.f32 %v1126_v24 }
0x1112   :  { %v1331_v23 = vpop.eup %1330 }
0x1113   :  { %875 = vrot.lane.b32.xlu0 %v1331_v23, %s1370_s1 }
0x1114   :  { %v1333_v6 = vpop.eup %1332 }
0x1115   :  { %v869_v25 = vadd.f32 1.0, %v1333_v6 }
0x1117   :  { %1334 = vrcp.f32 %v869_v25 }
0x1124   :  { %v1335_v26 = vpop.eup %1334 }
0x1125   :  { %v873_v8 = vmul.f32 %v1335_v26, %v783_v9 }
0x1185   :  { %v876_v27 = vpop.permute.xlu0 %875 }
0x1186   :  { %v878_v28 = vmul.f32 %v1335_v26, %v876_v27 }
0x1188   :  { %880 = vrot.lane.b32.xlu1 %v878_v28, %s1371_s27 }
0x11fa   :  { %v881_v29 = vpop.permute.xlu1 %880 }
0x11fb   :  { %v883_v30 = vadd.f32 %v881_v29, %v873_v8 }
0x11fd   :  { %1336 = vtanh.f32 %v883_v30 }
0x120a   :  { %v1337_v31 = vpop.eup %1336 }
0x120b   :  { %886 = vrot.lane.b32.xlu0 %v1337_v31, %s1372_s3 }
0x127d   :  { %v887_v32 = vpop.permute.xlu0 %886 }
0x127e   :  { %v889_v33 = vmul.f32 %v1335_v26, %v887_v32 }
0x1280   :  { %891 = vrot.lane.b32.xlu1 %v889_v33, %s1373_s28 }
0x12f2   :  { %v892_v34 = vpop.permute.xlu1 %891 }
0x12f3   :  { %1264 = vmatmul.mubr.msk.f32.vlgmr.msra.gmra.mxu1 %vm187_vm4, %v892_v34 }
0x13b3   :  { %v961_v36 = vpop.f32.mrf.mxu1 }
0x13b4   :  { %v965_v37 = vadd.f32 %v961_v36, %v184_v35 }
0x13b5   :  { %v1265_v38 = vpop.f32.mrf.mxu1 }
0x13b6   :  { %1338 = vtanh.f32 %v965_v37  ;;  %v1129_v40 = vmul.f32 -1.442695, %v965_v37 }
0x13b8   :  { %1340 = vpow2.f32 %v1129_v40 }
0x13c3   :  { %v1339_v39 = vpop.eup %1338 }
0x13c4   :  { %975 = vrot.lane.b32.xlu0 %v1339_v39, %s1370_s1 }
0x13c5   :  { %v1341_v41 = vpop.eup %1340 }
0x13c6   :  { %v969_v42 = vadd.f32 1.0, %v1341_v41 }
0x13c8   :  { %1342 = vrcp.f32 %v969_v42 }
0x13d5   :  { %v1343_v43 = vpop.eup %1342 }
0x13d6   :  { %v973_v46 = vmul.f32 %v1343_v43, %v883_v30 }
0x1436   :  { %v976_v44 = vpop.permute.xlu0 %975 }
0x1437   :  { %v978_v45 = vmul.f32 %v1343_v43, %v976_v44 }
0x1439   :  { %980 = vrot.lane.b32.xlu1 %v978_v45, %s1371_s27 }
0x14ab   :  { %v981_v47 = vpop.permute.xlu1 %980 }
0x14ac   :  { %v983_v19 = vadd.f32 %v981_v47, %v973_v46 }
0x14ae   :  { %1344 = vtanh.f32 %v983_v19 }
0x14bb   :  { %v1345_v50 = vpop.eup %1344 }
0x14bc   :  { %986 = vrot.lane.b32.xlu0 %v1345_v50, %s1372_s3 }
0x152e   :  { %v987_v51 = vpop.permute.xlu0 %986 }
0x152f   :  { %v989_v52 = vmul.f32 %v1343_v43, %v987_v51 }
0x1531   :  { %1000 = vrot.lane.b32.xlu1 %v989_v52, %s1373_s28 }
0x15a3   :  { %v1001_v53 = vpop.permute.xlu1 %1000 }
0x15a4   :  { %1271 = vmatmul.mubr.msk.f32.vlgmr.msra.gmra.mxu0 %vm187_vm4, %v1001_v53 }
0x1664   :  { %v1073_v56 = vpop.f32.mrf.mxu0 }
0x1665   :  { %v1074_v57 = vadd.f32 %v1130_v55, %v1073_v56 }
0x1666   :  { %v1272_v58 = vpop.f32.mrf.mxu0 }
0x1667   :  { %1079 = vperm.xlu0 %1281, %v1074_v57  }
0x16e2   :  { %v1080_v3 = vpop.permute.xlu0 %1079 }
0x16e3   :  { %1082 = vst [vmem:[#allocation3] sm:$0xff] %v1080_v3 }
0x16e4   :  { %1357 = shalt.err (!%p1354_p4)
}
0x16e5   :  { %1092 = dma.vmem_to_hbm [thread:$0]  %s1090_s18, 128, %s1616_s6, [#allocation4]  }
0x16e6   :  { %1366 = dma.done.wait [#allocation4], 128  }
0x16e7   :  { %1367 = vsyncadd [#allocation4], 4294967168 }
0x16e8   :  { %1096 = vsyncpa [#allocation4], 1 }

</bundles_post_ra>
